<compile_context>
chip_gen: v7x
topology: tpu7x:2x2x1
jax: 0.10.0
libtpu: 0.0.40
codegen_flags: <defaults>
</compile_context>

<pallas_src>
import functools

import jax
import jax.numpy as jnp
from jax.experimental import pallas as pl
from jax.experimental.pallas import tpu as pltpu


def loop_head_kernel(src_ref, dst_ref,
                     w1t_ref, b1_ref, w2t_ref, b2_ref,
                     wp1s_ref, wp1d_ref, bp1_ref,
                     wp2_ref, bp2_ref,
                     out_ref):
    tb, L, E = src_ref.shape
    w1t = w1t_ref[...]
    w2t = w2t_ref[...]
    cdt = w1t.dtype                                  # matmul operand dtype (bf16 or f32)

    # ---- shared MLP: src & dst fused into ONE first matmul (2*tb*L rows on the MXU) ----
    x = jnp.concatenate([src_ref[...].reshape(tb * L, E),
                         dst_ref[...].reshape(tb * L, E)], axis=0)    # (2*tb*L, E)
    h = jnp.dot(x, w1t, preferred_element_type=jnp.float32) + b1_ref[...]
    h = jnp.maximum(h, 0.0)                                           # ReLU, f32
    h = h.reshape(2, tb * L, E)                                       # [src-rows, dst-rows]

    def pool_and_project(rows):                                       # (tb*L, E) f32
        # mean over L (sublane axis) BEFORE the second, linear matmul (exact rewrite)
        pooled = jnp.mean(rows.reshape(tb, L, E), axis=1)             # (tb, E)
        return (jnp.dot(pooled.astype(cdt), w2t,
                        preferred_element_type=jnp.float32) + b2_ref[...])

    s = pool_and_project(h[0])                                        # (tb, E)
    d = pool_and_project(h[1])                                        # (tb, E)

    # ---- projection Linear(2E->2E): lane concat eliminated via split weight halves ----
    p = (jnp.dot(s.astype(cdt), wp1s_ref[...], preferred_element_type=jnp.float32)
         + jnp.dot(d.astype(cdt), wp1d_ref[...], preferred_element_type=jnp.float32)
         + bp1_ref[...])
    p = jnp.maximum(p, 0.0)                                           # (tb, 2E)

    # ---- Linear(2E->1) + Sigmoid on the VPU/XLU (avoid an N=1 MXU matmul) ----
    logit = jnp.sum(p * wp2_ref[...], axis=-1, keepdims=True) + bp2_ref[...]   # (tb, 1)
    out_ref[...] = jax.nn.sigmoid(logit).reshape(out_ref.shape)


@functools.partial(jax.jit, static_argnames=("batch_tile", "compute_dtype"))
def loop_head(src, dst, params, *, batch_tile=128, compute_dtype=jnp.bfloat16):
    """src, dst: (B, L, E) channels-last activations.  Returns (B,) probabilities."""
    w1, b1, w2, b2, wp1, bp1, wp2, bp2 = params
    B, L, E = src.shape

    tb = max(1, min(batch_tile, B))           # batch rows per grid step
    nb = pl.cdiv(B, tb)
    Bp = nb * tb

    src_c = src.astype(compute_dtype)
    dst_c = dst.astype(compute_dtype)
    if Bp != B:                               # pad batch to a multiple of the tile
        pad = ((0, Bp - B), (0, 0), (0, 0))
        src_c = jnp.pad(src_c, pad)
        dst_c = jnp.pad(dst_c, pad)

    # Weight glue (outside the hot path): pre-transpose to (in, out); split the
    # Linear(2E->2E) weight into src/dst halves so the kernel never concats along lanes.
    w1t   = jnp.transpose(w1).astype(compute_dtype)            # (E, E)
    w2t   = jnp.transpose(w2).astype(compute_dtype)            # (E, E)
    wp1ts = jnp.transpose(wp1[:, :E]).astype(compute_dtype)    # (E, 2E)
    wp1td = jnp.transpose(wp1[:, E:]).astype(compute_dtype)    # (E, 2E)
    b1r   = b1.reshape(1, E).astype(jnp.float32)
    b2r   = b2.reshape(1, E).astype(jnp.float32)
    bp1r  = bp1.reshape(1, 2 * E).astype(jnp.float32)
    wp2r  = wp2.reshape(1, 2 * E).astype(jnp.float32)          # used on the VPU, keep f32
    bp2r  = bp2.reshape(1, 1).astype(jnp.float32)

    pinned = lambda shape: pl.BlockSpec(shape, lambda i, _s=shape: (0,) * len(_s))
    act_spec = pl.BlockSpec((tb, L, E), lambda i: (i, 0, 0))

    bpe = jnp.dtype(compute_dtype).itemsize
    flops = (2 * (2 * Bp * L) * E * E           # fused first matmul
             + 2 * (2 * Bp) * E * E             # second matmul (after the mean)
             + 2 * Bp * (2 * E) * (2 * E)       # projection 2E->2E
             + 2 * Bp * (2 * E))                # final 2E->1 on the VPU
    bytes_accessed = (2 * Bp * L * E * bpe                       # src + dst
                      + (2 * E * E + 2 * E * 2 * E) * bpe        # matmul weights
                      + (2 * E + 2 * 2 * E + 1 + 2 * E + 1) * 4  # biases + wp2 row
                      + 4 * Bp)                                  # output

    out = pl.pallas_call(
        loop_head_kernel,
        grid=(nb,),
        in_specs=[
            act_spec, act_spec,
            pinned((E, E)), pinned((1, E)),
            pinned((E, E)), pinned((1, E)),
            pinned((E, 2 * E)), pinned((E, 2 * E)), pinned((1, 2 * E)),
            pinned((1, 2 * E)), pinned((1, 1)),
        ],
        out_specs=pl.BlockSpec((1, tb, 1), lambda i: (i, 0, 0)),
        out_shape=jax.ShapeDtypeStruct((nb, tb, 1), jnp.float32),
        compiler_params=pltpu.CompilerParams(
            dimension_semantics=("parallel",),            # megacore sharding on v7x
            vmem_limit_bytes=32 * 1024 * 1024,            # safe on v5e/v6e/v7x
        ),
        cost_estimate=pl.CostEstimate(
            flops=int(flops), transcendentals=int(Bp), bytes_accessed=int(bytes_accessed)),
    )(src_c, dst_c, w1t, b1r, w2t, b2r, wp1ts, wp1td, bp1r, wp2r, bp2r)

    return out.reshape(-1)[:B]                            # flatten() -> (B,)


def loop_head_ncl(src_ncl, dst_ncl, params, **kw):
    """Glue for PyTorch NCL inputs (B, E, L), matching nn.Conv1d's layout."""
    return loop_head(jnp.transpose(src_ncl, (0, 2, 1)),
                     jnp.transpose(dst_ncl, (0, 2, 1)), params, **kw)


def loop_head_reference(src_ncl, dst_ncl, params):
    """Pure-JAX reference matching the PyTorch forward exactly (NCL layout)."""
    w1, b1, w2, b2, wp1, bp1, wp2, bp2 = params

    def mlp(x):  # x: (B, E, L)
        h = jnp.einsum('oc,bcl->bol', w1, x) + b1[None, :, None]
        h = jnp.maximum(h, 0.0)
        h = jnp.einsum('oc,bcl->bol', w2, h) + b2[None, :, None]
        return h

    s = jnp.mean(mlp(src_ncl), axis=-1)               # (B, E)
    d = jnp.mean(mlp(dst_ncl), axis=-1)
    cat = jnp.concatenate([s, d], axis=-1)            # (B, 2E)
    p = jnp.maximum(cat @ wp1.T + bp1, 0.0)
    logit = p @ wp2.T + bp2
    return jax.nn.sigmoid(logit).reshape(-1)


def init_params(key, emb_dim):
    """Deterministic synthetic params; shapes follow the PyTorch __init__."""
    ks = jax.random.split(key, 8)
    scale = 0.1
    w1 = jax.random.normal(ks[0], (emb_dim, emb_dim), jnp.float32) * scale   # Conv1d.weight[:, :, 0]
    b1 = jax.random.normal(ks[1], (emb_dim,), jnp.float32) * scale
    w2 = jax.random.normal(ks[2], (emb_dim, emb_dim), jnp.float32) * scale
    b2 = jax.random.normal(ks[3], (emb_dim,), jnp.float32) * scale
    wp1 = jax.random.normal(ks[4], (2 * emb_dim, 2 * emb_dim), jnp.float32) * scale
    bp1 = jax.random.normal(ks[5], (2 * emb_dim,), jnp.float32) * scale
    wp2 = jax.random.normal(ks[6], (1, 2 * emb_dim), jnp.float32) * scale
    bp2 = jax.random.normal(ks[7], (1,), jnp.float32) * scale
    return (w1, b1, w2, b2, wp1, bp1, wp2, bp2)


if __name__ == "__main__":
    B, L, E = 4, 8, 32           # batch of frame pairs, positions per frame, embedding dim
    key = jax.random.PRNGKey(0)
    k_src, k_dst, k_par = jax.random.split(key, 3)

    # Producer emits channels-last (B, L, E); the PyTorch NCL view is its transpose.
    src = jax.random.normal(k_src, (B, L, E), jnp.float32)
    dst = jax.random.normal(k_dst, (B, L, E), jnp.float32)
    params = init_params(k_par, E)

    src_ncl = jnp.transpose(src, (0, 2, 1))   # (B, E, L) for the PyTorch-faithful reference
    dst_ncl = jnp.transpose(dst, (0, 2, 1))
    ref = jax.block_until_ready(loop_head_reference(src_ncl, dst_ncl, params))

    # f32 path: all rewrites (mean-before-matmul, fused src/dst, split concat, VPU tail)
    # are algebraically exact, so this must match tightly.  batch_tile=2 -> 2-step grid.
    out_f32 = jax.block_until_ready(
        loop_head(src, dst, params, batch_tile=2, compute_dtype=jnp.float32))
    assert out_f32.shape == (B,), out_f32.shape
    assert jnp.allclose(out_f32, ref, atol=1e-4, rtol=1e-4), (out_f32, ref)

    # bf16 matmul path (f32 accumulation): looser tolerance.
    out_bf16 = jax.block_until_ready(
        loop_head(src, dst, params, batch_tile=2, compute_dtype=jnp.bfloat16))
    assert out_bf16.shape == (B,), out_bf16.shape
    assert jnp.allclose(out_bf16, ref, atol=2e-2, rtol=2e-2), (out_bf16, ref)

    # PyTorch-layout (NCL) glue wrapper.
    out_ncl = jax.block_until_ready(
        loop_head_ncl(src_ncl, dst_ncl, params, batch_tile=2, compute_dtype=jnp.float32))
    assert jnp.allclose(out_ncl, ref, atol=1e-4, rtol=1e-4), (out_ncl, ref)

    print("KERNEL_OK")
</pallas_src>

<mosaic_0001>
module attributes {stable_mosaic.version = 11 : i64} {
  func.func @loop_head_kernel(%arg0: i32, %arg1: memref<2x8x32xf32, #tpu.memory_space<vmem>>, %arg2: memref<2x8x32xf32, #tpu.memory_space<vmem>>, %arg3: memref<32x32xf32, #tpu.memory_space<vmem>>, %arg4: memref<1x32xf32, #tpu.memory_space<vmem>>, %arg5: memref<32x32xf32, #tpu.memory_space<vmem>>, %arg6: memref<1x32xf32, #tpu.memory_space<vmem>>, %arg7: memref<32x64xf32, #tpu.memory_space<vmem>>, %arg8: memref<32x64xf32, #tpu.memory_space<vmem>>, %arg9: memref<1x64xf32, #tpu.memory_space<vmem>>, %arg10: memref<1x64xf32, #tpu.memory_space<vmem>>, %arg11: memref<1x1xf32, #tpu.memory_space<vmem>>, %arg12: memref<1x2x1xf32, #tpu.memory_space<vmem>>) attributes {dimension_semantics = [#tpu.dimension_semantics<parallel>], iteration_bounds = array<i64: 2>, scalar_prefetch = 0 : i64, scratch_operands = 0 : i64, tpu.core_type = #tpu.core_type<tc>, window_params = [{transform_indices = @transform_0, window_bounds = array<i64: 2, 8, 32>}, {transform_indices = @transform_1, window_bounds = array<i64: 2, 8, 32>}, {pipeline_mode = #tpu.pipeline_mode<synchronous>, transform_indices = @transform_2, window_bounds = array<i64: 32, 32>}, {pipeline_mode = #tpu.pipeline_mode<synchronous>, transform_indices = @transform_3, window_bounds = array<i64: 1, 32>}, {pipeline_mode = #tpu.pipeline_mode<synchronous>, transform_indices = @transform_4, window_bounds = array<i64: 32, 32>}, {pipeline_mode = #tpu.pipeline_mode<synchronous>, transform_indices = @transform_5, window_bounds = array<i64: 1, 32>}, {pipeline_mode = #tpu.pipeline_mode<synchronous>, transform_indices = @transform_6, window_bounds = array<i64: 32, 64>}, {pipeline_mode = #tpu.pipeline_mode<synchronous>, transform_indices = @transform_7, window_bounds = array<i64: 32, 64>}, {pipeline_mode = #tpu.pipeline_mode<synchronous>, transform_indices = @transform_8, window_bounds = array<i64: 1, 64>}, {pipeline_mode = #tpu.pipeline_mode<synchronous>, transform_indices = @transform_9, window_bounds = array<i64: 1, 64>}, {pipeline_mode = #tpu.pipeline_mode<synchronous>, transform_indices = @transform_10, window_bounds = array<i64: 1, 1>}, {transform_indices = @transform_11, window_bounds = array<i64: 1, 2, 1>}]} {
    %c0 = arith.constant 0 : index
    %c0_0 = arith.constant 0 : index
    %0 = vector.load %arg3[%c0, %c0_0] : memref<32x32xf32, #tpu.memory_space<vmem>>, vector<32x32xf32>
    %c0_1 = arith.constant 0 : index
    %c0_2 = arith.constant 0 : index
    %1 = vector.load %arg5[%c0_1, %c0_2] : memref<32x32xf32, #tpu.memory_space<vmem>>, vector<32x32xf32>
    %c0_3 = arith.constant 0 : index
    %c0_4 = arith.constant 0 : index
    %c0_5 = arith.constant 0 : index
    %2 = vector.load %arg1[%c0_3, %c0_4, %c0_5] : memref<2x8x32xf32, #tpu.memory_space<vmem>>, vector<2x8x32xf32>
    %3 = vector.shape_cast %2 : vector<2x8x32xf32> to vector<16x32xf32>
    %c0_6 = arith.constant 0 : index
    %c0_7 = arith.constant 0 : index
    %c0_8 = arith.constant 0 : index
    %4 = vector.load %arg2[%c0_6, %c0_7, %c0_8] : memref<2x8x32xf32, #tpu.memory_space<vmem>>, vector<2x8x32xf32>
    %5 = vector.shape_cast %4 : vector<2x8x32xf32> to vector<16x32xf32>
    %6 = tpu.concatenate %3, %5 in 0 : vector<16x32xf32>, vector<16x32xf32> -> vector<32x32xf32>
    %cst = arith.constant dense<0.000000e+00> : vector<32x32xf32>
    %7 = tpu.matmul %6, %0, %cst {dimension_numbers = #tpu.dot_dimension_numbers<[1], [0], [0], [1], [0, 0, 1, 1], [], []>} : vector<32x32xf32>, vector<32x32xf32>, vector<32x32xf32> -> vector<32x32xf32>
    %c0_9 = arith.constant 0 : index
    %c0_10 = arith.constant 0 : index
    %8 = vector.load %arg4[%c0_9, %c0_10] : memref<1x32xf32, #tpu.memory_space<vmem>>, vector<1x32xf32>
    %9 = vector.broadcast %8 : vector<1x32xf32> to vector<32x32xf32>
    %10 = arith.addf %7, %9 : vector<32x32xf32>
    %cst_11 = arith.constant 0.000000e+00 : f32
    %11 = vector.broadcast %cst_11 : f32 to vector<32x32xf32>
    %12 = arith.maximumf %10, %11 : vector<32x32xf32>
    %13 = vector.shape_cast %12 : vector<32x32xf32> to vector<2x16x32xf32>
    %14 = vector.extract_strided_slice %13 {offsets = [0, 0, 0], sizes = [1, 16, 32], strides = [1, 1, 1]} : vector<2x16x32xf32> to vector<1x16x32xf32>
    %15 = vector.shape_cast %14 : vector<1x16x32xf32> to vector<16x32xf32>
    %16 = vector.shape_cast %15 : vector<16x32xf32> to vector<2x8x32xf32>
    %cst_12 = arith.constant dense<0.000000e+00> : vector<2x32xf32>
    %17 = vector.multi_reduction <add>, %16, %cst_12 [1] : vector<2x8x32xf32> to vector<2x32xf32>
    %cst_13 = arith.constant 8.000000e+00 : f32
    %18 = vector.broadcast %cst_13 : f32 to vector<2x32xf32>
    %19 = arith.divf %17, %18 : vector<2x32xf32>
    %cst_14 = arith.constant dense<0.000000e+00> : vector<2x32xf32>
    %20 = tpu.matmul %19, %1, %cst_14 {dimension_numbers = #tpu.dot_dimension_numbers<[1], [0], [0], [1], [0, 0, 1, 1], [], []>} : vector<2x32xf32>, vector<32x32xf32>, vector<2x32xf32> -> vector<2x32xf32>
    %c0_15 = arith.constant 0 : index
    %c0_16 = arith.constant 0 : index
    %21 = vector.load %arg6[%c0_15, %c0_16] : memref<1x32xf32, #tpu.memory_space<vmem>>, vector<1x32xf32>
    %22 = vector.broadcast %21 : vector<1x32xf32> to vector<2x32xf32>
    %23 = arith.addf %20, %22 : vector<2x32xf32>
    %24 = vector.extract_strided_slice %13 {offsets = [1, 0, 0], sizes = [1, 16, 32], strides = [1, 1, 1]} : vector<2x16x32xf32> to vector<1x16x32xf32>
    %25 = vector.shape_cast %24 : vector<1x16x32xf32> to vector<16x32xf32>
    %26 = vector.shape_cast %25 : vector<16x32xf32> to vector<2x8x32xf32>
    %cst_17 = arith.constant dense<0.000000e+00> : vector<2x32xf32>
    %27 = vector.multi_reduction <add>, %26, %cst_17 [1] : vector<2x8x32xf32> to vector<2x32xf32>
    %cst_18 = arith.constant 8.000000e+00 : f32
    %28 = vector.broadcast %cst_18 : f32 to vector<2x32xf32>
    %29 = arith.divf %27, %28 : vector<2x32xf32>
    %cst_19 = arith.constant dense<0.000000e+00> : vector<2x32xf32>
    %30 = tpu.matmul %29, %1, %cst_19 {dimension_numbers = #tpu.dot_dimension_numbers<[1], [0], [0], [1], [0, 0, 1, 1], [], []>} : vector<2x32xf32>, vector<32x32xf32>, vector<2x32xf32> -> vector<2x32xf32>
    %c0_20 = arith.constant 0 : index
    %c0_21 = arith.constant 0 : index
    %31 = vector.load %arg6[%c0_20, %c0_21] : memref<1x32xf32, #tpu.memory_space<vmem>>, vector<1x32xf32>
    %32 = vector.broadcast %31 : vector<1x32xf32> to vector<2x32xf32>
    %33 = arith.addf %30, %32 : vector<2x32xf32>
    %c0_22 = arith.constant 0 : index
    %c0_23 = arith.constant 0 : index
    %34 = vector.load %arg7[%c0_22, %c0_23] : memref<32x64xf32, #tpu.memory_space<vmem>>, vector<32x64xf32>
    %cst_24 = arith.constant dense<0.000000e+00> : vector<2x64xf32>
    %35 = tpu.matmul %23, %34, %cst_24 {dimension_numbers = #tpu.dot_dimension_numbers<[1], [0], [0], [1], [0, 0, 1, 1], [], []>} : vector<2x32xf32>, vector<32x64xf32>, vector<2x64xf32> -> vector<2x64xf32>
    %c0_25 = arith.constant 0 : index
    %c0_26 = arith.constant 0 : index
    %36 = vector.load %arg8[%c0_25, %c0_26] : memref<32x64xf32, #tpu.memory_space<vmem>>, vector<32x64xf32>
    %cst_27 = arith.constant dense<0.000000e+00> : vector<2x64xf32>
    %37 = tpu.matmul %33, %36, %cst_27 {dimension_numbers = #tpu.dot_dimension_numbers<[1], [0], [0], [1], [0, 0, 1, 1], [], []>} : vector<2x32xf32>, vector<32x64xf32>, vector<2x64xf32> -> vector<2x64xf32>
    %38 = arith.addf %35, %37 : vector<2x64xf32>
    %c0_28 = arith.constant 0 : index
    %c0_29 = arith.constant 0 : index
    %39 = vector.load %arg9[%c0_28, %c0_29] : memref<1x64xf32, #tpu.memory_space<vmem>>, vector<1x64xf32>
    %40 = vector.broadcast %39 : vector<1x64xf32> to vector<2x64xf32>
    %41 = arith.addf %38, %40 : vector<2x64xf32>
    %cst_30 = arith.constant 0.000000e+00 : f32
    %42 = vector.broadcast %cst_30 : f32 to vector<2x64xf32>
    %43 = arith.maximumf %41, %42 : vector<2x64xf32>
    %c0_31 = arith.constant 0 : index
    %c0_32 = arith.constant 0 : index
    %44 = vector.load %arg10[%c0_31, %c0_32] : memref<1x64xf32, #tpu.memory_space<vmem>>, vector<1x64xf32>
    %45 = vector.broadcast %44 : vector<1x64xf32> to vector<2x64xf32>
    %46 = arith.mulf %43, %45 : vector<2x64xf32>
    %cst_33 = arith.constant dense<0.000000e+00> : vector<2xf32>
    %47 = vector.multi_reduction <add>, %46, %cst_33 [1] : vector<2x64xf32> to vector<2xf32>
    %48 = vector.shape_cast %47 : vector<2xf32> to vector<2x1xf32>
    %c0_34 = arith.constant 0 : index
    %c0_35 = arith.constant 0 : index
    %49 = vector.load %arg11[%c0_34, %c0_35] : memref<1x1xf32, #tpu.memory_space<vmem>>, vector<1x1xf32>
    %50 = vector.broadcast %49 : vector<1x1xf32> to vector<2x1xf32>
    %51 = arith.addf %48, %50 : vector<2x1xf32>
    %52 = arith.negf %51 : vector<2x1xf32>
    %53 = math.exp %52 : vector<2x1xf32>
    %cst_36 = arith.constant 1.000000e+00 : f32
    %54 = vector.broadcast %cst_36 : f32 to vector<2x1xf32>
    %55 = arith.addf %54, %53 : vector<2x1xf32>
    %56 = arith.divf %54, %55 : vector<2x1xf32>
    %57 = vector.shape_cast %56 : vector<2x1xf32> to vector<1x2x1xf32>
    %c0_37 = arith.constant 0 : index
    %c0_38 = arith.constant 0 : index
    %c0_39 = arith.constant 0 : index
    %58 = vector.load %arg12[%c0_37, %c0_38, %c0_39] : memref<1x2x1xf32, #tpu.memory_space<vmem>>, vector<1x2x1xf32>
    tpu.vector_store %arg12[%c0_37, %c0_38, %c0_39], %57 {strides = array<i32>} : memref<1x2x1xf32, #tpu.memory_space<vmem>>, vector<1x2x1xf32>,
    return
  }
  func.func @transform_0(%arg0: i32) -> (i32, i32, i32) {
    %c0_i32 = arith.constant 0 : i32
    %c0_i32_0 = arith.constant 0 : i32
    %c0_i32_1 = arith.constant 0 : i32
    return %arg0, %c0_i32, %c0_i32_0 : i32, i32, i32
  }
  func.func @transform_1(%arg0: i32) -> (i32, i32, i32) {
    %c0_i32 = arith.constant 0 : i32
    %c0_i32_0 = arith.constant 0 : i32
    %c0_i32_1 = arith.constant 0 : i32
    return %arg0, %c0_i32, %c0_i32_0 : i32, i32, i32
  }
  func.func @transform_2(%arg0: i32) -> (i32, i32) {
    %c0_i32 = arith.constant 0 : i32
    %c0_i32_0 = arith.constant 0 : i32
    %c0_i32_1 = arith.constant 0 : i32
    return %c0_i32, %c0_i32_0 : i32, i32
  }
  func.func @transform_3(%arg0: i32) -> (i32, i32) {
    %c0_i32 = arith.constant 0 : i32
    %c0_i32_0 = arith.constant 0 : i32
    %c0_i32_1 = arith.constant 0 : i32
    return %c0_i32, %c0_i32_0 : i32, i32
  }
  func.func @transform_4(%arg0: i32) -> (i32, i32) {
    %c0_i32 = arith.constant 0 : i32
    %c0_i32_0 = arith.constant 0 : i32
    %c0_i32_1 = arith.constant 0 : i32
    return %c0_i32, %c0_i32_0 : i32, i32
  }
  func.func @transform_5(%arg0: i32) -> (i32, i32) {
    %c0_i32 = arith.constant 0 : i32
    %c0_i32_0 = arith.constant 0 : i32
    %c0_i32_1 = arith.constant 0 : i32
    return %c0_i32, %c0_i32_0 : i32, i32
  }
  func.func @transform_6(%arg0: i32) -> (i32, i32) {
    %c0_i32 = arith.constant 0 : i32
    %c0_i32_0 = arith.constant 0 : i32
    %c0_i32_1 = arith.constant 0 : i32
    return %c0_i32, %c0_i32_0 : i32, i32
  }
  func.func @transform_7(%arg0: i32) -> (i32, i32) {
    %c0_i32 = arith.constant 0 : i32
    %c0_i32_0 = arith.constant 0 : i32
    %c0_i32_1 = arith.constant 0 : i32
    return %c0_i32, %c0_i32_0 : i32, i32
  }
  func.func @transform_8(%arg0: i32) -> (i32, i32) {
    %c0_i32 = arith.constant 0 : i32
    %c0_i32_0 = arith.constant 0 : i32
    %c0_i32_1 = arith.constant 0 : i32
    return %c0_i32, %c0_i32_0 : i32, i32
  }
  func.func @transform_9(%arg0: i32) -> (i32, i32) {
    %c0_i32 = arith.constant 0 : i32
    %c0_i32_0 = arith.constant 0 : i32
    %c0_i32_1 = arith.constant 0 : i32
    return %c0_i32, %c0_i32_0 : i32, i32
  }
  func.func @transform_10(%arg0: i32) -> (i32, i32) {
    %c0_i32 = arith.constant 0 : i32
    %c0_i32_0 = arith.constant 0 : i32
    %c0_i32_1 = arith.constant 0 : i32
    return %c0_i32, %c0_i32_0 : i32, i32
  }
  func.func @transform_11(%arg0: i32) -> (i32, i32, i32) {
    %c0_i32 = arith.constant 0 : i32
    %c0_i32_0 = arith.constant 0 : i32
    %c0_i32_1 = arith.constant 0 : i32
    return %arg0, %c0_i32, %c0_i32_0 : i32, i32, i32
  }
}

</mosaic_0001>

<bundles_post_ra>
// kernel: loop_head.1
= control target key start
LH: loop header
LB: loop body
LE: loop exit
PB: predicated region body
PF: predicated region fallthrough
CT: control target
= control target key end

     0   :  { %s1212_s19 = smov 0   ;;  %s1321_s0 = inlined_call_operand.vmem [shape: f32[4,8,32], index: 0, kind: input, shape index: {}]   ;;  %s1322_s1 = inlined_call_operand.vmem [shape: f32[4,8,32], index: 1, kind: input, shape index: {}]   ;;  %s1323_s2 = inlined_call_operand.vmem [shape: f32[32,32], index: 2, kind: input, shape index: {}]   ;;  %s1324_s3 = inlined_call_operand.vmem [shape: f32[1,32], index: 3, kind: input, shape index: {}]   ;;  %s1325_s4 = inlined_call_operand.vmem [shape: f32[32,32], index: 4, kind: input, shape index: {}]   ;;  %s1326_s5 = inlined_call_operand.vmem [shape: f32[1,32], index: 5, kind: input, shape index: {}]   ;;  %s1327_s6 = inlined_call_operand.vmem [shape: f32[32,64], index: 6, kind: input, shape index: {}]   ;;  %s1328_s7 = inlined_call_operand.vmem [shape: f32[32,64], index: 7, kind: input, shape index: {}]   ;;  %s1329_s8 = inlined_call_operand.vmem [shape: f32[1,64], index: 8, kind: input, shape index: {}]   ;;  %s1330_s9 = inlined_call_operand.vmem [shape: f32[1,64], index: 9, kind: input, shape index: {}]   ;;  %s1331_s10 = inlined_call_operand.<no memory space> [shape: f32[1,1], index: 10, kind: input, shape index: {}]   ;;  %s1332_s11 = inlined_call_operand.vmem [shape: f32[2,2,1], index: 11, kind: output, shape index: {}]  }
   0x1   :  { %v16_v0 = vstv %s1331_s10 }
   0x2   :  { %17 = vst [vmem:[#allocation2] sm:$0x1] %v16_v0 }
   0x3 LB: > { %s1218_s20 = sadd.s32 4294967295, %s1144_s19   ;;  %p983_p0 = scmp.ge.s32.totalorder %s1144_s19, 1  ;;  %s1144_s19 = sphi %s1212_s19, %s23_s19  }
   0x4   : > { %p351_p1 = scmp.lt.s32.totalorder %s1144_s19, 3 }
   0x6   : > { %p352_p2 = pnand %p983_p0, %p351_p1 }
   0x7   : > { %v411_v1 = vld [vmem:[%s1323_s2] sm:$0xff] (!%p352_p2)  ;;  %v412_v2 = vld [vmem:[%s1323_s2 + $0x8] sm:$0xff] (!%p352_p2)  ;;  %v413_v3 = vld [vmem:[%s1323_s2 + $0x10] sm:$0xff] (!%p352_p2)  ;;  %s984_s26 = sshll.u32 (!%p352_p2), %s1218_s20, 1  ;;  %vm430_vm0 = vcmask (!%p352_p2), 261120   ;;  %v1146_v14 = vmov (!%p352_p2), 0.0|0.0  }
   0x8   : > { %355 = sbr.rel (%p352_p2) target bundleno = 863 (0x35f), region = 64  ;;  %v1091_v4 = vpack.c.bf16 (!%p352_p2), %v412_v2, %v411_v1  ;;  %v414_v5 = vld [vmem:[%s1323_s2 + $0x18] sm:$0xff] (!%p352_p2)  ;;  %p396_p3 = scmp.lt.s32.totalorder (!%p352_p2), %s984_s26, 3  ;;  %v415_v11 = vld [vmem:[%s1325_s4] sm:$0xff] (!%p352_p2)  ;;  %v416_v12 = vld [vmem:[%s1325_s4 + $0x8] sm:$0xff] (!%p352_p2)  ;;  %1099 = vmatprep.subr.bf16.mxu1 (!%p352_p2), %v1146_v14  ;;  %vm1147_vm1 = vmmov (!%p352_p2), 0  }
   0x9   : > { %v1095_v6 = vpack.c.bf16 (!%p352_p2), %v414_v5, %v413_v3  ;;  %v1100_v13 = vpack.c.bf16 (!%p352_p2), %v416_v12, %v415_v11  ;;  %v417_v15 = vld [vmem:[%s1325_s4 + $0x10] sm:$0xff] (!%p352_p2)  ;;  %v418_v16 = vld [vmem:[%s1325_s4 + $0x18] sm:$0xff] (!%p352_p2)  ;;  %v1148_v18 = vmov (!%p352_p2), 0.0   ;;  %v989_v19 = vld [vmem:[%s1324_s3] ss:$0 sm:$0xff] (!%p352_p2)  ;;  %vm558_vm2 = vcmask (!%p352_p2), 1041409  }
   0xa   : > { %1092 = vmatprep.subr.bf16.mxu0 (!%p352_p2), %v1091_v4  ;;  %v1103_v17 = vpack.c.bf16 (!%p352_p2), %v418_v16, %v417_v15  ;;  %1055 = vmatprep.mubr.msk.f32.mxu1 (!%p352_p2), %vm1147_vm1, %v1148_v18  ;;  %v723_v61 = vld [vmem:[%s1327_s6] sm:$0xff] (!%p352_p2)  ;;  %v724_v62 = vld [vmem:[%s1327_s6 + $0x8] sm:$0xff] (!%p352_p2)  ;;  %v729_v11 = vld [vmem:[%s1328_s7 + $0x10] sm:$0xff] (!%p352_p2)  ;;  %vm894_vm3 = vcmask (!%p352_p2), 517120   ;;  %p407_p4 = scmp.lt.s32.totalorder (!%p352_p2), %s1218_s20, 1  ;;  %vm912_vm4 = vcmask (!%p352_p2), 1024  }
   0xb   : > { %1094 = vmatpush3.bf16.msra.mxu0 (!%p352_p2), %v1091_v4  ;;  %1101 = vmatpush3.bf16.msra.mxu1 (!%p352_p2), %v1100_v13  ;;  %v1118_v3 = vpack.c.bf16 (!%p352_p2), %v724_v62, %v723_v61  ;;  %v727_v5 = vld [vmem:[%s1328_s7] sm:$0xff] (!%p352_p2)  ;;  %v730_v12 = vld [vmem:[%s1328_s7 + $0x18] sm:$0xff] (!%p352_p2) }
   0xc   : > { %1096 = vmatprep.subr.bf16.mxu0 (!%p352_p2), %v1095_v6  ;;  %1102 = vmatprep.subr.bf16.mxu1 (!%p352_p2), %v1146_v14  ;;  %v994_v15 = vld [vmem:[%s1326_s5] ss:$0 sm:$0xff] (!%p352_p2) }
   0xf   : > { %s1334_s26 = smov (!%p396_p3, %s984_s26), 3  ;;  %1098 = vmatpush3.bf16.msra.mxu0 %v1095_v6  ;;  %1104 = vmatpush3.bf16.msra.mxu1 %v1103_v17  ;;  %v728_v6 = vld [vmem:[%s1328_s7 + $0x8] sm:$0xff]  ;;  %s1336_s20 = smov (!%p407_p4, %s1218_s20), 1 }
  0x10   : > { %s985_s29 = sshll.u32 %s1334_s26, 3  ;;  %1105 = vmatprep.subr.bf16.mxu0 %v1146_v14  ;;  %1111 = vmatprep.subr.bf16.mxu1 %v1146_v14 }
  0x11   : > { %s399_s13 = scalar_lea.vmem %s1321_s0, %s985_s29  ;;  %s405_s16 = scalar_lea.vmem %s1322_s1, %s985_s29 }
  0x12   : > { %v419_v7 = vld [vmem:[%s399_s13] sm:$0xff]  ;;  %v420_v8 = vld [vmem:[%s399_s13 + $0x8] sm:$0xff]  ;;  %s988_s13 = sshll.u32 %s1336_s20, 1 }
  0x13   : > { %1041 = vmatprep.mubr.msk.f32.mxu0 %vm430_vm0, %v419_v7  ;;  %v421_v9 = vld [vmem:[%s405_s16] sm:$0xff]  ;;  %v422_v10 = vld [vmem:[%s405_s16 + $0x8] sm:$0xff]  ;;  %v725_v7 = vld [vmem:[%s1327_s6 + $0x10] sm:$0xff]  ;;  %s410_s16 = scalar_lea.vmem %s1332_s11, %s988_s13 }
  0x14   : > { %1042 = vmatmul.mubr.msk.f32.vlgmr.msra.gmra.mrb[0].mxu0 %vm430_vm0, %v420_v8  ;;  %v1112_v8 = vpack.c.bf16 %v728_v6, %v727_v5 }
  0x15   : > { %1044 = vmatprep.mubr.msk.f32.mxu0 %vm430_vm0, %v421_v9  ;;  %1107 = vmatpush3.bf16.msra.mxu0 %v1100_v13  ;;  %v726_v9 = vld [vmem:[%s1327_s6 + $0x18] sm:$0xff]  ;;  %v1115_v13 = vpack.c.bf16 %v730_v12, %v729_v11 }
  0x16   : > { %1108 = vmatprep.subr.bf16.mxu0 %v1146_v14 }
  0x18   : > { %1045 = vmatmul.mubr.msk.f32.gmra.mrb[2].mxu0 %vm430_vm0, %v422_v10  ;;  %v1121_v10 = vpack.c.bf16 %v726_v9, %v725_v7 }
  0x19   : > { %1110 = vmatpush3.bf16.msra.mxu0 %v1103_v17  ;;  %1066 = vmatprep.mubr.msk.f32.mxu0 %vm1147_vm1, %v1148_v18 }
  0x1a   : > { %1117 = vmatprep.subr.bf16.mxu0 %v1146_v14 }
  0xe7   : > { %v1043_v20 = vpop.f32.mrb[0].mxu0 }
  0xe8   : > { %v515_v21 = vadd.f32 %v1043_v20, %v989_v19  ;;  %v509_v22 = vpop.f32.mrb[1].mxu0 }
  0xe9   : > { %v510_v23 = vadd.f32 %v989_v19, %v509_v22 }
  0xea   : > { %v529_v24 = vmax.f32 %v515_v21, 0.0 }
  0xeb   : > { %v528_v25 = vmax.f32 %v510_v23, 0.0  ;;  %v1046_v26 = vpop.f32.mrb[2].mxu0 }
  0xec   : > { %v539_v27 = vsel %vm430_vm0, %v529_v24, 0.0  ;;  %v525_v28 = vadd.f32 %v1046_v26, %v989_v19  ;;  %v519_v29 = vpop.f32.mrb[3].mxu0  ;;  %v999_v24 = vld [vmem:[%s1329_s8] ss:$0 sm:$0xff] }
  0xed   : > { %v540_v30 = vrot.slane %v539_v27, 4  ;;  %v532_v31 = vsel %vm430_vm0, %v528_v25, 0.0  ;;  %v520_v32 = vadd.f32 %v989_v19, %v519_v29 }
  0xee   : > { %v533_v33 = vrot.slane %v532_v31, 4  ;;  %v531_v34 = vmax.f32 %v525_v28, 0.0  ;;  %v1000_v28 = vld [vmem:[%s1330_s9] ss:$0 sm:$0xff] }
  0xef   : > { %v541_v35 = vadd.f32 %v540_v30, %v539_v27  ;;  %v530_v36 = vmax.f32 %v520_v32, 0.0  ;;  %v1001_v32 = vld [vmem:[#allocation2] ss:$0 sm:$0xff] }
  0xf0   : > { %v534_v37 = vadd.f32 %v533_v33, %v532_v31  ;;  %v639_v38 = vsel %vm430_vm0, %v531_v34, 0.0 }
  0xf1   : > { %v542_v39 = vrot.slane %v541_v35, 2  ;;  %v640_v40 = vrot.slane %v639_v38, 4  ;;  %v632_v41 = vsel %vm430_vm0, %v530_v36, 0.0 }
  0xf2   : > { %v535_v42 = vrot.slane %v534_v37, 2  ;;  %v633_v43 = vrot.slane %v632_v41, 4 }
  0xf3   : > { %v543_v44 = vadd.f32 %v542_v39, %v541_v35  ;;  %v641_v45 = vadd.f32 %v640_v40, %v639_v38 }
  0xf4   : > { %v536_v46 = vadd.f32 %v535_v42, %v534_v37  ;;  %v634_v47 = vadd.f32 %v633_v43, %v632_v41 }
  0xf5   : > { %v544_v48 = vrot.slane %v543_v44, 1  ;;  %v642_v49 = vrot.slane %v641_v45, 2 }
  0xf6   : > { %v537_v50 = vrot.slane %v536_v46, 1  ;;  %v635_v51 = vrot.slane %v634_v47, 2 }
  0xf7   : > { %v545_v52 = vadd.f32 %v544_v48, %v543_v44  ;;  %v643_v53 = vadd.f32 %v642_v49, %v641_v45 }
  0xf8   : > { %v538_v54 = vadd.f32 %v537_v50, %v536_v46  ;;  %v636_v55 = vadd.f32 %v635_v51, %v634_v47 }
  0xf9   : > { %v644_v56 = vrot.slane %v643_v53, 1  ;;  %v548_v57 = vmul.f32 0.125, %v545_v52 }
  0xfa   : > { %v637_v58 = vrot.slane %v636_v55, 1  ;;  %v547_v59 = vmul.f32 0.125, %v538_v54 }
  0xfb   : > { %v645_v60 = vadd.f32 %v644_v56, %v643_v53 }
  0xfc   : > { %v638_v63 = vadd.f32 %v637_v58, %v636_v55  ;;  %v559_v0 = vsel %vm558_vm2, %v548_v57, %v547_v59 }
  0xfd   : > { %v647_v1 = vmul.f32 0.125, %v645_v60  ;;  %1056 = vmatmul.mubr.msk.f32.vlgmr.msra.gmra.mrb[0].mxu1 %vm430_vm0, %v559_v0 }
  0xfe   : > { %v646_v2 = vmul.f32 0.125, %v638_v63  ;;  %1077 = vmatprep.mubr.msk.f32.mxu1 %vm1147_vm1, %v1148_v18  ;;  %1113 = vmatpush3.bf16.msra.mxu1 %v1112_v8 }
  0xff   : > { %1114 = vmatprep.subr.bf16.mxu1 %v1146_v14 }
 0x100   : > { %v650_v4 = vsel %vm558_vm2, %v647_v1, %v646_v2 }
 0x101   : > { %1067 = vmatmul.mubr.msk.f32.vlgmr.msra.gmra.mrb[4].mxu0 %vm430_vm0, %v650_v4 }
 0x102   : > { %1119 = vmatpush3.bf16.msra.mxu0 %v1118_v3  ;;  %1088 = vmatprep.mubr.msk.f32.mxu0 %vm1147_vm1, %v1148_v18 }
 0x103   : > { %1120 = vmatprep.subr.bf16.mxu0 %v1146_v14  ;;  %1116 = vmatpush3.bf16.msra.mxu1 %v1115_v13 }
 0x106   : > { %1122 = vmatpush3.bf16.msra.mxu0 %v1121_v10 }
 0x1d0   : > { %v628_v16 = vpop.f32.mrb[0].mxu1 }
 0x1d1   : > { %v629_v17 = vadd.f32 %v994_v15, %v628_v16  ;;  %v1057_v18 = vpop.f32.mrb[1].mxu1 }
 0x1d3   : > { %1089 = vmatmul.mubr.msk.f32.vlgmr.msra.gmra.mrb[6].mxu0 %vm430_vm0, %v629_v17 }
 0x1d4   : > { %v719_v14 = vpop.f32.mrb[4].mxu0 }
 0x1d5   : > { %v720_v19 = vadd.f32 %v994_v15, %v719_v14  ;;  %v1068_v20 = vpop.f32.mrb[5].mxu0 }
 0x1d7   : > { %1078 = vmatmul.mubr.msk.f32.vlgmr.msra.gmra.mrb[2].mxu1 %vm430_vm0, %v720_v19 }
 0x2a6   : > { %v873_v21 = vpop.f32.mrb[6].mxu0 }
 0x2a7   : > { %v1090_v22 = vpop.f32.mrb[7].mxu0 }
 0x2aa   : > { %v800_v23 = vpop.f32.mrb[2].mxu1 }
 0x2ab   : > { %v874_v25 = vadd.f32 %v873_v21, %v800_v23  ;;  %v1079_v26 = vpop.f32.mrb[3].mxu1 }
 0x2ad   : > { %v884_v27 = vadd.f32 %v999_v24, %v874_v25 }
 0x2af   : > { %v885_v29 = vmax.f32 %v884_v27, 0.0 }
 0x2b1   : > { %v893_v30 = vmul.f32 %v1000_v28, %v885_v29 }
 0x2b3   : > { %v895_v31 = vsel %vm894_vm3, %v893_v30, 0.0 }
 0x2b4   : > { %896 = vadd.xlane.f32.xlu0 %v895_v31 }
 0x341   : > { %v897_v33 = vpop.xlane.xlu0 %896 }
 0x342   : > { %v905_v34 = vadd.f32 %v1001_v32, %v897_v33 }
 0x344   : > { %v1002_v35 = vmul.f32 -1.442695, %v905_v34 }
 0x346   : > { %1134 = vpow2.f32 %v1002_v35 }
 0x350   : > { %v1135_v36 = vpop.eup %1134 }
 0x351   : > { %v909_v37 = vadd.f32 1.0, %v1135_v36 }
 0x353   : > { %1136 = vrcp.f32 %v909_v37 }
 0x35d   : > { %v1137_v38 = vpop.eup %1136 }
 0x35e   : > { %913 = vst.msk [vmem:[%s410_s16] sm:$0x3] %vm912_vm4, %v1137_v38 }
 0x35f PF: > { %s23_s19 = sadd.s32 1, %s1144_s19  }
 0x360   : > { %p20_p5 = scmp.ge.s32.totalorder %s23_s19, 4  }
 0x362   :  { %22 = sbr.rel (!%p20_p5) target bundleno = 3 (0x3), region = 97 }

</bundles_post_ra>
